<compile_context>
chip_gen: v5e
topology: v5e:2x2
jax: 0.10.0
libtpu: 0.0.40
codegen_flags: <defaults>
</compile_context>

<pallas_src>
import functools

import jax
import jax.numpy as jnp
from jax import lax
from jax.experimental import pallas as pl
from jax.experimental.pallas import tpu as pltpu

LN_EPS = 1e-5                    # nn.LayerNorm default eps
_MAX_ROW_TILE = 1024             # measured roofline plateau ~512-1024 rows
_MIN_PALLAS_BYTES = 256 * 1024   # below this, fused XLA LayerNorm wins


def _round_up(n, m):
    return ((n + m - 1) // m) * m


def _vmem_budgets():
    """(tile_budget_bytes, vmem_limit_bytes), per TPU generation."""
    try:
        cap = pltpu.get_tpu_info().vmem_capacity_bytes
    except Exception:
        cap = 64 * 1024 * 1024
    if cap >= 100 * 1024 * 1024:
        # v5e / v6e: 128 MiB physical VMEM -> bigger tiles amortize the
        # ~0.35 us per-grid-step overhead.  Explicit limit also covers v5e's
        # 16 MiB scoped default.
        return 40 * 1024 * 1024, 80 * 1024 * 1024
    # v7x: 64 MiB physical / 32 MiB scoped default -> stay conservative.
    return 14 * 1024 * 1024, 40 * 1024 * 1024


def _row_axis_semantics():
    """CORE_PARALLEL on v7x (2 TensorCores/chip), plain PARALLEL otherwise."""
    try:
        kind = jax.devices()[0].device_kind.lower()
    except Exception:
        kind = ""
    if "v7" in kind:
        return (pltpu.CORE_PARALLEL,)
    return ("parallel",)


def _pick_row_tile(rows, width, dtype, tile_budget):
    """Largest multiple-of-8 row tile within the VMEM budget.

    Budgets the double-buffered input + output DMA tiles AND the in-kernel
    f32 staging values (x / diff / y), which matter when dtype < f32
    (prevents a v7x-only spill/OOM regression).  Also caps the tile so the
    row grid keeps >= 2 steps when possible (v7x megacore; DMA overlap).
    """
    itemsize = jnp.dtype(dtype).itemsize
    io_bytes = 4 * width * itemsize                       # 2 in-bufs + 2 out-bufs
    staging = (3 if itemsize < 4 else 2) * 4 * width      # live f32 intermediates
    per_row = io_bytes + staging
    rt = tile_budget // max(per_row, 1)
    rt = min(rt, _MAX_ROW_TILE, _round_up(rows, 8))
    if rows > 8:
        rt = min(rt, max(8, _round_up((rows + 1) // 2, 8)))
    return int(max(8, (rt // 8) * 8))


def _block_spec(shape, index_map, pipeline_mode=None):
    if pipeline_mode is None:
        return pl.BlockSpec(shape, index_map)
    try:
        return pl.BlockSpec(shape, index_map, pipeline_mode=pipeline_mode)
    except TypeError:  # older BlockSpec without pipeline_mode support
        return pl.BlockSpec(shape, index_map)


def _ln_kernel(x_ref, g_ref, b_ref, o_ref):
    """LayerNorm over the last (lane) axis of a (row_tile, D) tile.

    Two-pass variance: the second pass re-reads data already in VMEM/vregs,
    so it is free under HBM slack and numerically robust.
    """
    x = x_ref[...].astype(jnp.float32)
    inv_d = jnp.float32(1.0 / x.shape[-1])
    mean = jnp.sum(x, axis=-1, keepdims=True) * inv_d
    diff = x - mean
    var = jnp.sum(diff * diff, axis=-1, keepdims=True) * inv_d
    inv = lax.rsqrt(var + LN_EPS)
    y = diff * inv * g_ref[...].astype(jnp.float32) + b_ref[...].astype(jnp.float32)
    o_ref[...] = y.astype(o_ref.dtype)


def _ln_packed_kernel(x_ref, g_ref, b_ref, seg_ref, o_ref, *, d):
    """Lane-packed LayerNorm: each 128-lane row packs 128 // d logical rows.

    Segment sums via a matmul with a constant 128x128 block-diagonal ones
    matrix on the (otherwise idle) MXU; results come back broadcast across
    each d-lane segment, so mean/var/inv need no cross-lane relayout.
    """
    x = x_ref[...].astype(jnp.float32)
    seg = seg_ref[...]                                   # (128, 128) block-diag ones
    inv_d = jnp.float32(1.0 / d)
    mean = jnp.dot(x, seg, preferred_element_type=jnp.float32) * inv_d
    diff = x - mean
    var = jnp.dot(diff * diff, seg, preferred_element_type=jnp.float32) * inv_d
    inv = lax.rsqrt(var + LN_EPS)
    y = diff * inv * g_ref[...].astype(jnp.float32) + b_ref[...].astype(jnp.float32)
    o_ref[...] = y.astype(o_ref.dtype)


def _reference_layernorm(x, gamma, beta):
    xf = x.astype(jnp.float32)
    mean = jnp.mean(xf, axis=-1, keepdims=True)
    var = jnp.mean((xf - mean) ** 2, axis=-1, keepdims=True)
    return (xf - mean) / jnp.sqrt(var + LN_EPS) * gamma + beta


def pallas_layernorm(x2d, gamma, beta, *, force_pallas=False):
    """x2d: (R, D); gamma/beta: (D,).  LayerNorm over the last axis."""
    R, D = x2d.shape
    itemsize = jnp.dtype(x2d.dtype).itemsize

    # Tiny tensors: launch + pipeline fixed costs dominate; let XLA fuse it.
    if not force_pallas and R * D * itemsize < _MIN_PALLAS_BYTES:
        return _reference_layernorm(x2d, gamma, beta).astype(x2d.dtype)

    tile_budget, vmem_limit = _vmem_budgets()

    # Lane packing for D < 128 (biggest lever: dense 128-lane loads/stores).
    # The reshape is row-major and contiguous -> no extra HBM pass.
    pack = 128 // D if (D < 128 and 128 % D == 0) else 1
    packed = pack > 1 and R % pack == 0
    # (If R is not a multiple of the pack factor we fall back to the unpacked
    #  path instead of padding — padding would cost a full extra HBM pass.)

    if packed:
        rows, width = R // pack, 128
        x_in = x2d.reshape(rows, width)
        g_in = jnp.tile(gamma.astype(jnp.float32), pack).reshape(1, width)
        b_in = jnp.tile(beta.astype(jnp.float32), pack).reshape(1, width)
        lane_seg = jnp.arange(width, dtype=jnp.int32) // D
        seg = (lane_seg[:, None] == lane_seg[None, :]).astype(jnp.float32)
    else:
        rows, width = R, D
        x_in = x2d
        g_in = gamma.astype(jnp.float32).reshape(1, D)
        b_in = beta.astype(jnp.float32).reshape(1, D)
        seg = None

    row_tile = _pick_row_tile(rows, width, x2d.dtype, tile_budget)
    n_steps = pl.cdiv(rows, row_tile)        # partial final block handled by Pallas
    tile_bytes = row_tile * width * itemsize

    # Small tiles over many steps leave DMA latency exposed; triple-buffer them.
    pm = pl.Buffered(3) if (n_steps >= 3 and tile_bytes <= 512 * 1024) else None

    x_spec = _block_spec((row_tile, width), lambda i: (i, 0), pm)
    out_spec = _block_spec((row_tile, width), lambda i: (i, 0), pm)
    const_spec = _block_spec((1, width), lambda i: (0, 0))       # fetched once

    if packed:
        kernel = functools.partial(_ln_packed_kernel, d=D)
        in_specs = [x_spec, const_spec, const_spec,
                    _block_spec((width, width), lambda i: (0, 0))]
        args = (x_in, g_in, b_in, seg)
        flops = 4 * rows * width * width + 10 * rows * width
        extra_bytes = width * width * 4
    else:
        kernel = _ln_kernel
        in_specs = [x_spec, const_spec, const_spec]
        args = (x_in, g_in, b_in)
        flops = 10 * rows * width
        extra_bytes = 0

    cost = pl.CostEstimate(
        flops=int(flops),
        transcendentals=int(R),
        bytes_accessed=int(2 * rows * width * itemsize + 2 * width * 4 + extra_bytes),
    )

    out = pl.pallas_call(
        kernel,
        out_shape=jax.ShapeDtypeStruct((rows, width), x2d.dtype),
        grid_spec=pltpu.PrefetchScalarGridSpec(
            num_scalar_prefetch=0,
            grid=(n_steps,),
            in_specs=in_specs,
            out_specs=out_spec,
        ),
        compiler_params=pltpu.CompilerParams(
            dimension_semantics=_row_axis_semantics(),
            vmem_limit_bytes=vmem_limit,
        ),
        cost_estimate=cost,
    )(*args)

    return out.reshape(R, D) if packed else out


def decoder_forward(x, memory, params, num_layers, layer_fn=None, *, force_pallas=False):
    """
    Mirrors Decoder.forward:
        for layer in self.layers: x = layer(x, memory)
        return self.norm(x)

    x:      (batch, N, T', d_model)
    memory: (batch, N, T,  d_model)
    """
    # TODO(synk): `layer` is an injected abstract nn.Module (its class is not
    # defined in model/AGNN.py); the stacked layers are applied as opaque
    # callables here (identity by default) rather than faking their internals.
    for _ in range(num_layers):
        if layer_fn is not None:
            x = layer_fn(x, memory)

    B, N, Tq, D = x.shape
    y2d = pallas_layernorm(x.reshape(B * N * Tq, D), params["ln_gamma"],
                           params["ln_beta"], force_pallas=force_pallas)
    return y2d.reshape(B, N, Tq, D)


def init_decoder_params(key, d_model):
    # nn.LayerNorm default init is weight=1, bias=0; use deterministic random
    # values instead so the affine terms are exercised.
    kg, kb = jax.random.split(key)
    return {
        "ln_gamma": 1.0 + 0.1 * jax.random.normal(kg, (d_model,), jnp.float32),
        "ln_beta": 0.1 * jax.random.normal(kb, (d_model,), jnp.float32),
    }


if __name__ == "__main__":
    key = jax.random.PRNGKey(0)
    k_x, k_mem, k_p, k_g = jax.random.split(key, 4)

    # Shapes implied by Decoder.forward: x (batch, N, T', d_model).
    batch, n_nodes, t_q, t_kv, d_model = 2, 4, 8, 8, 32
    num_layers = 4

    x = jax.random.normal(k_x, (batch, n_nodes, t_q, d_model), jnp.float32)
    memory = jax.random.normal(k_mem, (batch, n_nodes, t_kv, d_model), jnp.float32)
    params = init_decoder_params(k_p, d_model)

    # 1) Lane-packed Pallas path (d_model = 32 -> 4 logical rows per 128-lane row).
    out = jax.block_until_ready(
        decoder_forward(x, memory, params, num_layers, force_pallas=True))
    ref = _reference_layernorm(x, params["ln_gamma"], params["ln_beta"])
    assert out.shape == (batch, n_nodes, t_q, d_model)
    assert jnp.allclose(out, ref, atol=1e-4, rtol=1e-4)

    # 2) Generic lane-dense path (d_model = 128) with a partial final row block.
    d128 = 128
    kx2, kg2, kb2 = jax.random.split(k_g, 3)
    xw = jax.random.normal(kx2, (105, d128), jnp.float32)
    g128 = 1.0 + 0.1 * jax.random.normal(kg2, (d128,), jnp.float32)
    b128 = 0.1 * jax.random.normal(kb2, (d128,), jnp.float32)
    yw = jax.block_until_ready(pallas_layernorm(xw, g128, b128, force_pallas=True))
    refw = _reference_layernorm(xw, g128, b128)
    assert jnp.allclose(yw, refw, atol=1e-4, rtol=1e-4)

    # 3) d_model < 128 with a row count not divisible by the pack factor
    #    -> unpacked Pallas path, masked narrow stores + partial final block.
    x3 = jax.random.normal(k_x, (3, 5, 7, d_model), jnp.float32)   # R = 105
    out3 = jax.block_until_ready(
        decoder_forward(x3, x3, params, num_layers, force_pallas=True))
    ref3 = _reference_layernorm(x3, params["ln_gamma"], params["ln_beta"])
    assert jnp.allclose(out3, ref3, atol=1e-4, rtol=1e-4)

    # 4) Auto dispatch: tiny tensors skip the Pallas launch entirely.
    out4 = jax.block_until_ready(decoder_forward(x, memory, params, num_layers))
    assert jnp.allclose(out4, ref, atol=1e-4, rtol=1e-4)

    print("KERNEL_OK")
</pallas_src>

<mosaic_0001>
module attributes {stable_mosaic.version = 11 : i64} {
  func.func @_ln_packed_kernel(%arg0: i32, %arg1: memref<8x128xf32, #tpu.memory_space<vmem>>, %arg2: memref<1x128xf32, #tpu.memory_space<vmem>>, %arg3: memref<1x128xf32, #tpu.memory_space<vmem>>, %arg4: memref<128x128xf32, #tpu.memory_space<vmem>>, %arg5: memref<8x128xf32, #tpu.memory_space<vmem>>) attributes {dimension_semantics = [#tpu.dimension_semantics<parallel>], iteration_bounds = array<i64: 2>, scalar_prefetch = 0 : i64, scratch_operands = 0 : i64, tpu.core_type = #tpu.core_type<tc>, window_params = [{transform_indices = @transform_0, window_bounds = array<i64: 8, 128>}, {pipeline_mode = #tpu.pipeline_mode<synchronous>, transform_indices = @transform_1, window_bounds = array<i64: 1, 128>}, {pipeline_mode = #tpu.pipeline_mode<synchronous>, transform_indices = @transform_2, window_bounds = array<i64: 1, 128>}, {pipeline_mode = #tpu.pipeline_mode<synchronous>, transform_indices = @transform_3, window_bounds = array<i64: 128, 128>}, {transform_indices = @transform_4, window_bounds = array<i64: 8, 128>}]} {
    %c0 = arith.constant 0 : index
    %c0_0 = arith.constant 0 : index
    %0 = vector.load %arg1[%c0, %c0_0] : memref<8x128xf32, #tpu.memory_space<vmem>>, vector<8x128xf32>
    %c0_1 = arith.constant 0 : index
    %c0_2 = arith.constant 0 : index
    %1 = vector.load %arg4[%c0_1, %c0_2] : memref<128x128xf32, #tpu.memory_space<vmem>>, vector<128x128xf32>
    %cst = arith.constant dense<0.000000e+00> : vector<8x128xf32>
    %2 = tpu.matmul %0, %1, %cst {dimension_numbers = #tpu.dot_dimension_numbers<[1], [0], [0], [1], [0, 0, 1, 1], [], []>} : vector<8x128xf32>, vector<128x128xf32>, vector<8x128xf32> -> vector<8x128xf32>
    %cst_3 = arith.constant 3.125000e-02 : f32
    %3 = vector.broadcast %cst_3 : f32 to vector<8x128xf32>
    %4 = arith.mulf %2, %3 : vector<8x128xf32>
    %5 = arith.subf %0, %4 : vector<8x128xf32>
    %6 = arith.mulf %5, %5 : vector<8x128xf32>
    %cst_4 = arith.constant dense<0.000000e+00> : vector<8x128xf32>
    %7 = tpu.matmul %6, %1, %cst_4 {dimension_numbers = #tpu.dot_dimension_numbers<[1], [0], [0], [1], [0, 0, 1, 1], [], []>} : vector<8x128xf32>, vector<128x128xf32>, vector<8x128xf32> -> vector<8x128xf32>
    %cst_5 = arith.constant 3.125000e-02 : f32
    %8 = vector.broadcast %cst_5 : f32 to vector<8x128xf32>
    %9 = arith.mulf %7, %8 : vector<8x128xf32>
    %cst_6 = arith.constant 9.99999974E-6 : f32
    %10 = vector.broadcast %cst_6 : f32 to vector<8x128xf32>
    %11 = arith.addf %9, %10 : vector<8x128xf32>
    %12 = math.rsqrt %11 : vector<8x128xf32>
    %13 = arith.mulf %5, %12 : vector<8x128xf32>
    %c0_7 = arith.constant 0 : index
    %c0_8 = arith.constant 0 : index
    %14 = vector.load %arg2[%c0_7, %c0_8] : memref<1x128xf32, #tpu.memory_space<vmem>>, vector<1x128xf32>
    %15 = vector.broadcast %14 : vector<1x128xf32> to vector<8x128xf32>
    %16 = arith.mulf %13, %15 : vector<8x128xf32>
    %c0_9 = arith.constant 0 : index
    %c0_10 = arith.constant 0 : index
    %17 = vector.load %arg3[%c0_9, %c0_10] : memref<1x128xf32, #tpu.memory_space<vmem>>, vector<1x128xf32>
    %18 = vector.broadcast %17 : vector<1x128xf32> to vector<8x128xf32>
    %19 = arith.addf %16, %18 : vector<8x128xf32>
    %c0_11 = arith.constant 0 : index
    %c0_12 = arith.constant 0 : index
    %20 = vector.load %arg5[%c0_11, %c0_12] : memref<8x128xf32, #tpu.memory_space<vmem>>, vector<8x128xf32>
    tpu.vector_store %arg5[%c0_11, %c0_12], %19 {strides = array<i32>} : memref<8x128xf32, #tpu.memory_space<vmem>>, vector<8x128xf32>,
    return
  }
  func.func @transform_0(%arg0: i32) -> (i32, i32) {
    %c0_i32 = arith.constant 0 : i32
    %c0_i32_0 = arith.constant 0 : i32
    return %arg0, %c0_i32 : i32, i32
  }
  func.func @transform_1(%arg0: i32) -> (i32, i32) {
    %c0_i32 = arith.constant 0 : i32
    %c0_i32_0 = arith.constant 0 : i32
    %c0_i32_1 = arith.constant 0 : i32
    return %c0_i32, %c0_i32_0 : i32, i32
  }
  func.func @transform_2(%arg0: i32) -> (i32, i32) {
    %c0_i32 = arith.constant 0 : i32
    %c0_i32_0 = arith.constant 0 : i32
    %c0_i32_1 = arith.constant 0 : i32
    return %c0_i32, %c0_i32_0 : i32, i32
  }
  func.func @transform_3(%arg0: i32) -> (i32, i32) {
    %c0_i32 = arith.constant 0 : i32
    %c0_i32_0 = arith.constant 0 : i32
    %c0_i32_1 = arith.constant 0 : i32
    return %c0_i32, %c0_i32_0 : i32, i32
  }
  func.func @transform_4(%arg0: i32) -> (i32, i32) {
    %c0_i32 = arith.constant 0 : i32
    %c0_i32_0 = arith.constant 0 : i32
    return %arg0, %c0_i32 : i32, i32
  }
}

</mosaic_0001>

<bundles_post_ra>
// kernel: tpu_custom_call.1
= control target key start
LH: loop header
LB: loop body
LE: loop exit
PB: predicated region body
PF: predicated region fallthrough
CT: control target
= control target key end

     0   :  { %9 = vsyncpa [#allocation3], 0  ;;  %s866_s0 = inlined_call_operand.hbm [shape: f32[16,128], index: 0, kind: input, shape index: {}]   ;;  %s867_s1 = inlined_call_operand.hbm [shape: f32[1,128], index: 1, kind: input, shape index: {}]   ;;  %s868_s2 = inlined_call_operand.vmem [shape: f32[1,128], index: 2, kind: input, shape index: {}]   ;;  %s869_s3 = inlined_call_operand.hbm [shape: f32[128,128], index: 3, kind: input, shape index: {}]   ;;  %s870_s4 = inlined_call_operand.hbm [shape: f32[16,128], index: 4, kind: output, shape index: {}]  }
   0x1   :  { %11 = vsyncpa [#allocation3 + $0x1], 0 }
   0x2   :  { %12 = vsyncpa [#allocation6], 0 }
   0x3   :  { %13 = vsyncpa [#allocation4], 0 }
   0x4   :  { %15 = vsyncpa [#allocation4 + $0x1], 0  ;;  %s715_s15 = smov 0   ;;  %s717_s16 = smov 0  }
   0x5   :  { %s719_s17 = smov 0   ;;  %s721_s18 = smov 0  }
   0x6 LB: > { %s736_s19 = sadd.s32 4294967295, %s684_s18   ;;  %s435_s20 = sadd.s32 4294967294, %s684_s18   ;;  %s684_s18 = sphi %s721_s18, %s880_s18   ;;  %s680_s17 = sphi %s719_s17, %s879_s17   ;;  %s676_s16 = sphi %s717_s16, %s878_s16   ;;  %s672_s15 = sphi %s715_s15, %s877_s15  }
   0x7   : > { %p41_p0 = scmp.ne.s32.totalorder %s676_s16, %s672_s15  ;;  %p42_p1 = scmp.eq.s32.totalorder %s736_s19, 0 }
   0x8   : > { %p128_p2 = scmp.eq.s32.totalorder %s736_s19, 1  ;;  %p134_p3 = scmp.eq.s32.totalorder %s435_s20, 1 }
   0x9   : > { %p745_p4 = por %p42_p1, %p41_p0  ;;  %p436_p5 = scmp.ge.s32.totalorder %s684_s18, 1 }
   0xa   : > { %p750_p6 = por %p134_p3, %p41_p0  ;;  %p141_p7 = scmp.lt.s32.totalorder %s684_s18, 3 }
   0xb   : > { %s153_s25 = sshll.u32 %s867_s1, 4  ;;  %s686_s27 = smov [#allocation5]   ;;  %s154_s25 = int_to_ptr.hbm [resolvable:$true] %s153_s25 }
   0xc   : > { %p758_p8 = pnand %p436_p5, %p141_p7  ;;  %s155_s28 = sshll.u32 %s686_s27, 4  ;;  %s156_s28 = int_to_ptr.vmem [resolvable:$true] %s155_s28 }
   0xd   : > { %s167_s5 = sshll.u32 %s869_s3, 4  ;;  %s687_s6 = smov [#allocation7]   ;;  %s168_s5 = int_to_ptr.hbm [resolvable:$true] %s167_s5 }
   0xe   : > { %p463_p10 = pneg %p758_p8  ;;  %s169_s7 = sshll.u32 %s687_s6, 4  ;;  %s170_s7 = int_to_ptr.vmem [resolvable:$true] %s169_s7 }
   0xf   : > { %s688_s8 = smov 128   ;;  %s689_s9 = smov 8  }
  0x10   : > { %p464_p11 = pnand %p463_p10, %p42_p1  ;;  %s771_s10 = sadd.s32 1, %s684_s18  }
  0x11   : > { %s25_s11 = ssub.s32 %s684_s18, %s771_s10  ;;  %s28_s12 = sadd.s32 1, %s680_s17 }
  0x12   : > { %466 = dma.hbm_to_vmem [thread:$0]  (!%p464_p11), %s154_s25, 16, %s156_s28, [#allocation6]  }
  0x13   : > { %469 = dma.hbm_to_vmem [thread:$0]  (!%p464_p11), %s168_s5, 2048, %s170_s7, [#allocation6], %s688_s8, %s688_s8, %s689_s9  }
  0x14   : > { %p26_p12 = scmp.eq.s32.totalorder %s25_s11, 0  ;;  %p35_p13 = scmp.ne.s32.totalorder %s680_s17, %s676_s16 }
  0x15   : > { %p36_p0 = scmp.eq.s32.totalorder %s684_s18, 0  ;;  %p480_p7 = scmp.lt.s32.totalorder %s684_s18, 2 }
  0x16   : > { %s780_s13 = scalar_select %p26_p12, %s680_s17, %s28_s12  }
  0x17   : > { %p37_p3 = por %p36_p0, %p35_p13  ;;  %p784_p5 = por %p128_p2, %p35_p13 }
  0x18   : > { %s183_s20 = sand.u32 1, %s680_s17   ;;  %s441_s24 = sshll.u32 %s684_s18, 3 }
  0x19   : > { %s440_s23 = sshll.u32 %s183_s20, 3  ;;  %s191_s28 = scalar_lea.hbm %s866_s0, %s441_s24 }
  0x1a   : > { %s187_s29 = scalar_lea.vmem [#allocation2], %s440_s23  ;;  %s193_s5 = sshll.u32 %s191_s28, 4  ;;  %s194_s5 = int_to_ptr.hbm [resolvable:$true] %s193_s5 }
  0x1b   : > { %s195_s30 = sshll.u32 %s187_s29, 4  ;;  %p794_p10 = pnand %p480_p7, %p37_p3  ;;  %s196_s30 = int_to_ptr.vmem [resolvable:$true] %s195_s30 }
  0x1c   : > { %s184_s7 = scalar_lea.sflag [#allocation3], %s183_s20  ;;  %s584_s8 = sshra.s32 %s194_s5, 4  ;;  %s585_s8 = int_to_ptr.hbm [resolvable:$true] %s584_s8 }
  0x1d   : > { %s586_s9 = scalar_lea.hbm %s585_s8, 8  ;;  %p588_p11 = pneg %p794_p10 }
  0x1e   : > { %p587_p2 = scmp.ne.s32.totalorder %s585_s8, %s586_s9  ;;  %s591_s23 = scalar_lea.hbm %s866_s0, 16 }
  0x1f   : > { %p592_p0 = scmp.lt.s32.totalorder %s585_s8, %s866_s0  ;;  %p593_p3 = scmp.lt.s32.totalorder %s591_s23, %s586_s9 }
  0x20   : > { %p589_p12 = pnand %p588_p11, %p587_p2 }
  0x21   : > { %p594_p7 = por %p593_p3, %p592_p0 }
  0x22   : > { %p590_p13 = pneg %p589_p12 }
  0x24   : > { %p595_p9 = pnand %p594_p7, %p590_p13 }
  0x26   : > { %598 = shalt.err (!%p595_p9)
}
  0x27   : > { %473 = dma.hbm_to_vmem [thread:$0]  (!%p794_p10), %s194_s5, 128, %s196_s30, %s184_s7  }
  0x28   : > { %204 = sbr.rel (%p758_p8) target bundleno = 369 (0x171), region = 36  ;;  %s811_s20 = sand.u32 (!%p758_p8), 1, %s676_s16  }
  0x29   : > { %s443_s27 = sshll.u32 (!%p758_p8), %s811_s20, 3  ;;  %s207_s28 = scalar_lea.sflag (!%p758_p8), [#allocation3], %s811_s20 }
  0x2a   : > { %s817_s29 = scalar_lea.vmem (!%p758_p8), [#allocation2], %s443_s27 }
  0x2d   : > { %659 = dma.done.wait (%p745_p4), %s207_s28, 128  }
  0x2e   : > { %661 = vsyncadd (%p745_p4), %s207_s28, 4294967168 }
  0x2f   : > { %663 = dma.done.wait (%p42_p1), [#allocation6], 2064  }
  0x30   : > { %665 = vsyncadd (%p42_p1), [#allocation6], 4294965232  ;;  %v262_v0 = vld [vmem:[#allocation7 + $0x78] sm:$0xff]  ;;  %v261_v1 = vld [vmem:[#allocation7 + $0x70] sm:$0xff]  ;;  %s448_s21 = sshll.u32 %s736_s19, 3  ;;  %s245_s8 = scalar_lea.vmem [#allocation8], %s443_s27 }
  0x31   : > { %263 = vmatpush.msra.mxu0 %v262_v0  ;;  %286 = vmatpush.msra.mxu1 %v262_v0  ;;  %v260_v2 = vld [vmem:[#allocation7 + $0x68] sm:$0xff]  ;;  %v259_v3 = vld [vmem:[#allocation7 + $0x60] sm:$0xff]  ;;  %v258_v4 = vld [vmem:[#allocation7 + $0x58] sm:$0xff]  ;;  %s341_s5 = scalar_lea.hbm %s870_s4, %s448_s21  ;;  %s343_s9 = sshll.u32 %s245_s8, 4  ;;  %s344_s9 = int_to_ptr.vmem [resolvable:$true] %s343_s9 }
  0x32   : > { %v257_v5 = vld [vmem:[#allocation7 + $0x50] sm:$0xff]  ;;  %v256_v6 = vld [vmem:[#allocation7 + $0x48] sm:$0xff]  ;;  %v255_v7 = vld [vmem:[#allocation7 + $0x40] sm:$0xff]  ;;  %s345_s19 = sshll.u32 %s341_s5, 4  ;;  %s331_s11 = scalar_lea.sflag [#allocation4], %s811_s20  ;;  %s346_s19 = int_to_ptr.hbm [resolvable:$true] %s345_s19 }
  0x33   : > { %264 = vmatpush.msra.mxu0 %v261_v1  ;;  %287 = vmatpush.msra.mxu1 %v261_v1  ;;  %v254_v8 = vld [vmem:[#allocation7 + $0x38] sm:$0xff]  ;;  %v253_v9 = vld [vmem:[#allocation7 + $0x30] sm:$0xff]  ;;  %v252_v10 = vld [vmem:[#allocation7 + $0x28] sm:$0xff]  ;;  %s628_s12 = sshra.s32 %s346_s19, 4  ;;  %s634_s28 = scalar_lea.hbm %s870_s4, 16  ;;  %s629_s12 = int_to_ptr.hbm [resolvable:$true] %s628_s12 }
  0x34   : > { %v251_v11 = vld [vmem:[#allocation7 + $0x20] sm:$0xff]  ;;  %v250_v12 = vld [vmem:[#allocation7 + $0x18] sm:$0xff]  ;;  %v249_v13 = vld [vmem:[#allocation7 + $0x10] sm:$0xff]  ;;  %s630_s23 = scalar_lea.hbm %s629_s12, 8  ;;  %p635_p9 = scmp.lt.s32.totalorder %s629_s12, %s870_s4 }
  0x35   : > { %265 = vmatpush.msra.mxu0 %v260_v2  ;;  %288 = vmatpush.msra.mxu1 %v260_v2  ;;  %v248_v14 = vld [vmem:[#allocation7 + $0x8] sm:$0xff]  ;;  %v247_v15 = vld [vmem:[#allocation7] sm:$0xff]  ;;  %v520_v30 = vld [vmem:[#allocation5] ss:$0 sm:$0xff]  ;;  %p631_p1 = scmp.ne.s32.totalorder %s629_s12, %s630_s23  ;;  %p636_p10 = scmp.lt.s32.totalorder %s634_s28, %s630_s23 }
  0x36   : > { %v246_v16 = vld [vmem:[%s817_s29] sm:$0xff] }
  0x37   : > { %266 = vmatpush.msra.mxu0 %v259_v3  ;;  %289 = vmatpush.msra.mxu1 %v259_v3  ;;  %v521_v33 = vld [vmem:[%s868_s2] ss:$0 sm:$0xff]  ;;  %p632_p4 = pnand %p631_p1, %p784_p5  ;;  %p637_p2 = por %p636_p10, %p635_p9 }
  0x39   : > { %267 = vmatpush.msra.mxu0 %v258_v4  ;;  %290 = vmatpush.msra.mxu1 %v258_v4  ;;  %p633_p8 = pneg %p632_p4 }
  0x3b   : > { %268 = vmatpush.msra.mxu0 %v257_v5  ;;  %291 = vmatpush.msra.mxu1 %v257_v5  ;;  %p638_p11 = pnand %p637_p2, %p633_p8 }
  0x3d   : > { %269 = vmatpush.msra.mxu0 %v256_v6  ;;  %292 = vmatpush.msra.mxu1 %v256_v6 }
  0x3f   : > { %270 = vmatpush.msra.mxu0 %v255_v7  ;;  %293 = vmatpush.msra.mxu1 %v255_v7 }
  0x41   : > { %271 = vmatpush.msra.mxu0 %v254_v8  ;;  %294 = vmatpush.msra.mxu1 %v254_v8 }
  0x43   : > { %272 = vmatpush.msra.mxu0 %v253_v9  ;;  %295 = vmatpush.msra.mxu1 %v253_v9 }
  0x45   : > { %273 = vmatpush.msra.mxu0 %v252_v10  ;;  %296 = vmatpush.msra.mxu1 %v252_v10 }
  0x47   : > { %274 = vmatpush.msra.mxu0 %v251_v11  ;;  %297 = vmatpush.msra.mxu1 %v251_v11 }
  0x49   : > { %275 = vmatpush.msra.mxu0 %v250_v12  ;;  %298 = vmatpush.msra.mxu1 %v250_v12 }
  0x4b   : > { %276 = vmatpush.msra.mxu0 %v249_v13  ;;  %299 = vmatpush.msra.mxu1 %v249_v13 }
  0x4d   : > { %277 = vmatpush.msra.mxu0 %v248_v14  ;;  %300 = vmatpush.msra.mxu1 %v248_v14 }
  0x4f   : > { %278 = vmatpush.msra.mxu0 %v247_v15  ;;  %301 = vmatpush.msra.mxu1 %v247_v15 }
  0x50   : > { %279 = vmatmul.f32.vlgmr.msra.gmra.mxu0 %v246_v16 }
  0xcd   : > { %v280_v17 = vpop.f32.mrf.mxu0 }
  0xce   : > { %v283_v18 = vmul.f32 0.03125, %v280_v17 }
  0xd0   : > { %v284_v19 = vsub.f32 %v246_v16, %v283_v18 }
  0xd2   : > { %v285_v20 = vmul.f32 %v284_v19, %v284_v19 }
  0xd4   : > { %302 = vmatmul.f32.vlgmr.msra.gmra.mxu1 %v285_v20 }
 0x151   : > { %v303_v21 = vpop.f32.mrf.mxu1 }
 0x152   : > { %v306_v22 = vmul.f32 0.03125, %v303_v21 }
 0x154   : > { %v307_v23 = vadd.f32 1e-05, %v306_v22 }
 0x156   : > { %522 = vrsqrt.f32 %v307_v23  ;;  %vm314_vm1 = vweird.f32 %v307_v23 }
 0x15c   : > { %v523_v24 = vpop.eup %522 }
 0x15d   : > { %v309_v25 = vmul.f32 %v523_v24, %v307_v23  ;;  %vm315_vm0 = vweird.f32 %v523_v24 }
 0x15e   : > { %vm316_vm2 = vmor %vm314_vm1, %vm315_vm0 }
 0x15f   : > { %v310_v26 = vmul.f32 %v523_v24, %v309_v25 }
 0x161   : > { %v311_v27 = vmul.f32 0.5, %v310_v26 }
 0x163   : > { %v312_v28 = vsub.f32 1.5, %v311_v27 }
 0x165   : > { %v313_v29 = vmul.f32 %v523_v24, %v312_v28 }
 0x167   : > { %v317_v31 = vsel %vm316_vm2, %v523_v24, %v313_v29 }
 0x168   : > { %v318_v32 = vmul.f32 %v317_v31, %v284_v19 }
 0x16a   : > { %v323_v34 = vmul.f32 %v520_v30, %v318_v32 }
 0x16c   : > { %v328_v35 = vadd.f32 %v521_v33, %v323_v34 }
 0x16e   : > { %329 = vst [vmem:[%s245_s8] sm:$0xff] %v328_v35 }
 0x16f   : > { %641 = shalt.err (!%p638_p11)
}
 0x170   : > { %461 = dma.vmem_to_hbm [thread:$0]  (%p784_p5), %s344_s9, 128, %s346_s19, %s331_s11  }
 0x171 PF: > { %s357_s20 = sand.u32 1, %s672_s15   ;;  %p876_p12 = scmp.ge.s32.totalorder %s684_s18, 2 }
 0x172   : > { %s358_s21 = scalar_lea.sflag [#allocation4], %s357_s20 }
 0x173   : > { %p475_p13 = pnand %p876_p12, %p750_p6 }
 0x175   : > { %p476_p0 = pneg %p475_p13 }
 0x177   : > { %667 = dma.done.wait (%p476_p0), %s358_s21, 128  }
 0x178   : > { %669 = vsyncadd (%p476_p0), %s358_s21, 4294967168  ;;  %p18_p3 = scmp.ge.s32.totalorder %s771_s10, 4   ;;  %s877_s15 = smov %s676_s16 }
 0x179   : > { %s878_s16 = smov %s680_s17  ;;  %s879_s17 = smov %s780_s13 }
 0x17a   : > { %s880_s18 = smov %s771_s10  ;;  %20 = sbr.rel (!%p18_p3) target bundleno = 6 (0x6), region = 89 }
 0x17f   :  { %364 = vsyncpa [#allocation3], 1 }
 0x180   :  { %366 = vsyncpa [#allocation3 + $0x1], 1 }
 0x181   :  { %367 = vsyncpa [#allocation6], 1 }
 0x182   :  { %368 = vsyncpa [#allocation4], 1 }
 0x183   :  { %370 = vsyncpa [#allocation4 + $0x1], 1 }

</bundles_post_ra>
